<compile_context>
chip_gen: v6e
topology: v6e:2x2x1
jax: 0.10.0
libtpu: 0.0.40
codegen_flags: <defaults>
</compile_context>

<pallas_src>
import functools

import jax
import jax.numpy as jnp
from jax.experimental import pallas as pl
from jax.experimental.pallas import tpu as pltpu


LANE = 128
MIB = 1024 * 1024


def _round_up(x: int, m: int) -> int:
    return ((x + m - 1) // m) * m


def _itemsize(dt) -> int:
    return jnp.dtype(dt).itemsize


def _vmem_capacity_bytes() -> int:
    try:
        info = pltpu.get_tpu_info()
        cap = getattr(info, "vmem_capacity_bytes", None)
        if cap:
            return int(cap)
    except Exception:
        pass
    return 64 * MIB  # conservative fallback (v7x per-TC VMEM)


def _vmem_budget_bytes() -> int:
    cap = _vmem_capacity_bytes()
    # ~51 MiB usable on v7x (64 MiB physical), ~102 MiB on v5e/v6e (128 MiB).
    return min(int(0.8 * cap), cap - 8 * MIB)


# --------------------------------------------------------------------------- #
# Kernel
# --------------------------------------------------------------------------- #
def _mlp_kernel(x_ref, *refs, n_layers: int, final_tanh: bool):
    """Fused MLP group over one batch tile.

    refs = (w0, b0, w1, b1, ..., w_{L-1}, b_{L-1}, o_ref)
    Weights/biases are whole-array VMEM refs (single resident copy). The
    running activation `h` never leaves the chip between layers.
    """
    o_ref = refs[2 * n_layers]
    h = x_ref[...]
    for k in range(n_layers):
        w_ref = refs[2 * k]
        b_ref = refs[2 * k + 1]
        # MXU matmul with f32 accumulation; bias added once on the accumulator.
        y = jnp.dot(h, w_ref[...], preferred_element_type=jnp.float32)
        y = y + b_ref[...]
        if k < n_layers - 1:
            # tanh on EUP; cast back to compute dtype for the next MXU pass.
            h = jnp.tanh(y).astype(w_ref.dtype)
        elif final_tanh:
            # Last layer of a non-final group: tanh fused before HBM round-trip.
            o_ref[...] = jnp.tanh(y).astype(o_ref.dtype)
        else:
            # Final layer of the network: no tanh (matches forward).
            o_ref[...] = y.astype(o_ref.dtype)


# --------------------------------------------------------------------------- #
# Parameter preparation (done once, not per forward call)
# --------------------------------------------------------------------------- #
def prepare_mlp_params(params, compute_dtype=jnp.bfloat16):
    """Pad weights/biases to lane-dense (multiple-of-128) shapes and cast the
    weights to the compute dtype, once at parameter-setup time.

    params: list of (w, b) with w of shape (Din, Dout), b of shape (Dout,).
    """
    dims = [params[0][0].shape[0]] + [w.shape[1] for (w, _) in params]
    pdims = [_round_up(d, LANE) for d in dims]
    weights, biases = [], []
    for k, (w, b) in enumerate(params):
        din, dout = w.shape
        assert din == dims[k] and dout == dims[k + 1]
        w_p = jnp.zeros((pdims[k], pdims[k + 1]), compute_dtype).at[:din, :dout].set(
            w.astype(compute_dtype))
        b_p = jnp.zeros((1, pdims[k + 1]), jnp.float32).at[0, :dout].set(
            b.astype(jnp.float32))
        weights.append(w_p)
        biases.append(b_p)
    return dict(weights=weights, biases=biases, dims=dims, pdims=pdims,
                compute_dtype=jnp.dtype(compute_dtype))


# --------------------------------------------------------------------------- #
# VMEM planning
# --------------------------------------------------------------------------- #
def _group_vmem_need(pdims_g, tm, cdt, out_dt):
    need = 0
    for k in range(len(pdims_g) - 1):
        need += pdims_g[k] * pdims_g[k + 1] * _itemsize(cdt)   # weight, single copy
        need += pdims_g[k + 1] * 4                             # bias (f32)
    need += 2 * tm * pdims_g[0] * _itemsize(cdt)               # streamed x tile, 2 bufs
    need += 2 * tm * pdims_g[-1] * _itemsize(out_dt)           # streamed out tile, 2 bufs
    need += tm * max(pdims_g) * (4 + _itemsize(cdt))           # f32 acc + cdt activation
    return need


def _plan_groups(pdims, n_layers, tm, cdt, out_dtype, budget):
    """Greedy split of the layer stack into groups whose resident weights +
    streamed tiles fit the per-chip VMEM budget."""
    groups = []
    lo = 0
    while lo < n_layers:
        hi = lo + 1
        while hi < n_layers:
            out_dt = out_dtype if hi + 1 == n_layers else cdt
            est = int(1.25 * _group_vmem_need(pdims[lo:hi + 2], tm, cdt, out_dt)) + 2 * MIB
            if est <= budget:
                hi += 1
            else:
                break
        groups.append((lo, hi))   # layers [lo, hi)
        lo = hi
    return groups


# --------------------------------------------------------------------------- #
# One fused group = one pallas_call
# --------------------------------------------------------------------------- #
def _fused_group(x_p, weights, biases, pdims_g, *, tm, final_tanh, out_dtype):
    n_layers = len(weights)
    b_pad = x_p.shape[0]
    cdt = x_p.dtype
    grid = (b_pad // tm,)

    in_specs = [pl.BlockSpec((tm, pdims_g[0]), lambda i: (i, 0))]
    for _ in range(n_layers):
        # Grid-invariant weights/biases: whole array resident in VMEM, single
        # copy (no double-buffering of the weight stack).
        in_specs.append(pl.BlockSpec(memory_space=pltpu.MemorySpace.VMEM))
        in_specs.append(pl.BlockSpec(memory_space=pltpu.MemorySpace.VMEM))
    out_specs = pl.BlockSpec((tm, pdims_g[-1]), lambda i: (i, 0))

    flops = sum(2 * b_pad * pdims_g[k] * pdims_g[k + 1] for k in range(n_layers))
    n_tanh = n_layers - 1 + (1 if final_tanh else 0)
    transcendentals = sum(b_pad * pdims_g[k + 1] for k in range(n_tanh))
    bytes_accessed = (
        b_pad * pdims_g[0] * _itemsize(cdt)
        + sum(int(w.size) * _itemsize(w.dtype) for w in weights)
        + sum(int(b.size) * _itemsize(b.dtype) for b in biases)
        + b_pad * pdims_g[-1] * _itemsize(out_dtype)
    )

    # VMEM limit: >= the computed need (with margin), never above the chip's
    # physical capacity (minus headroom).
    need = _group_vmem_need(pdims_g, tm, cdt, out_dtype)
    vmem_limit = max(int(1.25 * need) + 2 * MIB, 32 * MIB)
    vmem_limit = min(vmem_limit, _vmem_capacity_bytes() - 4 * MIB)

    args = [x_p]
    for w, b in zip(weights, biases):
        args += [w, b]

    kernel = functools.partial(_mlp_kernel, n_layers=n_layers, final_tanh=final_tanh)
    return pl.pallas_call(
        kernel,
        out_shape=jax.ShapeDtypeStruct((b_pad, pdims_g[-1]), out_dtype),
        grid=grid,
        in_specs=in_specs,
        out_specs=out_specs,
        compiler_params=pltpu.CompilerParams(
            dimension_semantics=("parallel",),
            vmem_limit_bytes=int(vmem_limit),
        ),
        cost_estimate=pl.CostEstimate(
            flops=int(flops),
            transcendentals=int(transcendentals),
            bytes_accessed=int(bytes_accessed),
        ),
    )(*args)


# --------------------------------------------------------------------------- #
# Forward
# --------------------------------------------------------------------------- #
def mlp_forward(x, prepared, activation=None, *, tm=None):
    """Matches MLP.forward: tanh after every layer except the last; optional
    final `activation` callable applied to the last layer's output."""
    B, d0 = x.shape
    dims, pdims = prepared["dims"], prepared["pdims"]
    cdt = prepared["compute_dtype"]
    n_layers = len(prepared["weights"])
    assert d0 == dims[0]
    out_dtype = x.dtype

    budget = _vmem_budget_bytes()

    # Sub-32-bit dtypes pack along sublanes: use 16-row multiples for bf16.
    sub = 16 if _itemsize(cdt) < 4 else 8
    target_tm = 512 if budget > 80 * MIB else 256   # big tiles on 128 MiB chips
    if tm is None:
        tm = min(target_tm, _round_up(B, sub))
        # Guarantee >= 2 grid steps when the batch allows it so both of v7x's
        # TensorCores (and the DMA pipeline) get work; nearly free elsewhere.
        if _round_up(B, tm) // tm < 2 and B >= 2 * sub:
            tm = _round_up((B + 1) // 2, sub)
    b_pad = _round_up(B, tm)

    # Skip the padding copy when the input is already tile/lane aligned.
    if b_pad == B and pdims[0] == d0:
        h = x.astype(cdt)
    else:
        h = jnp.zeros((b_pad, pdims[0]), cdt).at[:B, :d0].set(x.astype(cdt))

    groups = _plan_groups(pdims, n_layers, tm, cdt, out_dtype, budget)
    n_groups = len(groups)
    for g, (lo, hi) in enumerate(groups):
        last = (g == n_groups - 1)
        h = _fused_group(
            h,
            prepared["weights"][lo:hi],
            prepared["biases"][lo:hi],
            pdims[lo:hi + 1],
            tm=tm,
            final_tanh=not last,                     # tanh fused at group seams
            out_dtype=out_dtype if last else cdt,    # intermediate groups stay in cdt
        )

    out = h if (b_pad == B and pdims[-1] == dims[-1]) else h[:B, :dims[-1]]
    if activation is not None:
        out = activation(out)
    return out


# --------------------------------------------------------------------------- #
# Reference / init / demo
# --------------------------------------------------------------------------- #
def init_mlp_params(key, layer_dims):
    """PyTorch-nn.Linear-style init: U(-1/sqrt(fan_in), +1/sqrt(fan_in)),
    stored already transposed to (Din, Dout) so the kernel does y = x @ W."""
    params = []
    for k in range(len(layer_dims) - 1):
        din, dout = layer_dims[k], layer_dims[k + 1]
        key, kw, kb = jax.random.split(key, 3)
        bound = 1.0 / float(din) ** 0.5
        w = jax.random.uniform(kw, (din, dout), jnp.float32, -bound, bound)
        b = jax.random.uniform(kb, (dout,), jnp.float32, -bound, bound)
        params.append((w, b))
    return params


def mlp_reference(x, params, activation=None):
    n_layers = len(params)
    for k, (w, b) in enumerate(params):
        x = x @ w + b
        if k < n_layers - 1:
            x = jnp.tanh(x)
    if activation is not None:
        x = activation(x)
    return x


if __name__ == "__main__":
    # Small shapes consistent with a generic MLP: batch=2, dims 4 -> 32 -> 32 -> 8
    layer_dims = (4, 32, 32, 8)
    batch = 2

    key = jax.random.PRNGKey(0)
    key_x, key_p = jax.random.split(key)
    x = jax.random.normal(key_x, (batch, layer_dims[0]), jnp.float32)
    params = init_mlp_params(key_p, layer_dims)
    ref = mlp_reference(x, params)

    # f32 compute path: tight check against the f32 reference.
    prepared_f32 = prepare_mlp_params(params, compute_dtype=jnp.float32)
    out_f32 = jax.block_until_ready(mlp_forward(x, prepared_f32))
    assert out_f32.shape == (batch, layer_dims[-1])
    assert jnp.allclose(out_f32, ref, atol=1e-5, rtol=1e-5)

    # Default fast path: bf16 MXU inputs, f32 accumulation / bias / tanh.
    prepared = prepare_mlp_params(params)   # compute_dtype=bfloat16 by default
    out_fast = jax.block_until_ready(mlp_forward(x, prepared))
    assert out_fast.shape == (batch, layer_dims[-1])
    assert jnp.allclose(out_fast.astype(jnp.float32), ref, atol=3e-2, rtol=3e-2)

    print("KERNEL_OK")
</pallas_src>

<mosaic_0001>
module attributes {stable_mosaic.version = 11 : i64} {
  func.func @_mlp_kernel(%arg0: i32, %arg1: memref<8x128xf32, #tpu.memory_space<vmem>>, %arg2: memref<128x128xf32, #tpu.memory_space<vmem>>, %arg3: memref<1x128xf32, #tpu.memory_space<vmem>>, %arg4: memref<128x128xf32, #tpu.memory_space<vmem>>, %arg5: memref<1x128xf32, #tpu.memory_space<vmem>>, %arg6: memref<128x128xf32, #tpu.memory_space<vmem>>, %arg7: memref<1x128xf32, #tpu.memory_space<vmem>>, %arg8: memref<8x128xf32, #tpu.memory_space<vmem>>) attributes {dimension_semantics = [#tpu.dimension_semantics<parallel>], iteration_bounds = array<i64: 1>, scalar_prefetch = 0 : i64, scratch_operands = 0 : i64, tpu.core_type = #tpu.core_type<tc>, window_params = [{transform_indices = @transform_0, window_bounds = array<i64: 8, 128>}, {pipeline_mode = #tpu.pipeline_mode<synchronous>, transform_indices = @transform_1, window_bounds = array<i64: 128, 128>}, {pipeline_mode = #tpu.pipeline_mode<synchronous>, transform_indices = @transform_2, window_bounds = array<i64: 1, 128>}, {pipeline_mode = #tpu.pipeline_mode<synchronous>, transform_indices = @transform_3, window_bounds = array<i64: 128, 128>}, {pipeline_mode = #tpu.pipeline_mode<synchronous>, transform_indices = @transform_4, window_bounds = array<i64: 1, 128>}, {pipeline_mode = #tpu.pipeline_mode<synchronous>, transform_indices = @transform_5, window_bounds = array<i64: 128, 128>}, {pipeline_mode = #tpu.pipeline_mode<synchronous>, transform_indices = @transform_6, window_bounds = array<i64: 1, 128>}, {transform_indices = @transform_7, window_bounds = array<i64: 8, 128>}]} {
    %c0 = arith.constant 0 : index
    %c0_0 = arith.constant 0 : index
    %0 = vector.load %arg1[%c0, %c0_0] : memref<8x128xf32, #tpu.memory_space<vmem>>, vector<8x128xf32>
    %c0_1 = arith.constant 0 : index
    %c0_2 = arith.constant 0 : index
    %1 = vector.load %arg2[%c0_1, %c0_2] : memref<128x128xf32, #tpu.memory_space<vmem>>, vector<128x128xf32>
    %cst = arith.constant dense<0.000000e+00> : vector<8x128xf32>
    %2 = tpu.matmul %0, %1, %cst {dimension_numbers = #tpu.dot_dimension_numbers<[1], [0], [0], [1], [0, 0, 1, 1], [], []>} : vector<8x128xf32>, vector<128x128xf32>, vector<8x128xf32> -> vector<8x128xf32>
    %c0_3 = arith.constant 0 : index
    %c0_4 = arith.constant 0 : index
    %3 = vector.load %arg3[%c0_3, %c0_4] : memref<1x128xf32, #tpu.memory_space<vmem>>, vector<1x128xf32>
    %4 = vector.broadcast %3 : vector<1x128xf32> to vector<8x128xf32>
    %5 = arith.addf %2, %4 : vector<8x128xf32>
    %6 = math.tanh %5 : vector<8x128xf32>
    %c0_5 = arith.constant 0 : index
    %c0_6 = arith.constant 0 : index
    %7 = vector.load %arg4[%c0_5, %c0_6] : memref<128x128xf32, #tpu.memory_space<vmem>>, vector<128x128xf32>
    %cst_7 = arith.constant dense<0.000000e+00> : vector<8x128xf32>
    %8 = tpu.matmul %6, %7, %cst_7 {dimension_numbers = #tpu.dot_dimension_numbers<[1], [0], [0], [1], [0, 0, 1, 1], [], []>} : vector<8x128xf32>, vector<128x128xf32>, vector<8x128xf32> -> vector<8x128xf32>
    %c0_8 = arith.constant 0 : index
    %c0_9 = arith.constant 0 : index
    %9 = vector.load %arg5[%c0_8, %c0_9] : memref<1x128xf32, #tpu.memory_space<vmem>>, vector<1x128xf32>
    %10 = vector.broadcast %9 : vector<1x128xf32> to vector<8x128xf32>
    %11 = arith.addf %8, %10 : vector<8x128xf32>
    %12 = math.tanh %11 : vector<8x128xf32>
    %c0_10 = arith.constant 0 : index
    %c0_11 = arith.constant 0 : index
    %13 = vector.load %arg6[%c0_10, %c0_11] : memref<128x128xf32, #tpu.memory_space<vmem>>, vector<128x128xf32>
    %cst_12 = arith.constant dense<0.000000e+00> : vector<8x128xf32>
    %14 = tpu.matmul %12, %13, %cst_12 {dimension_numbers = #tpu.dot_dimension_numbers<[1], [0], [0], [1], [0, 0, 1, 1], [], []>} : vector<8x128xf32>, vector<128x128xf32>, vector<8x128xf32> -> vector<8x128xf32>
    %c0_13 = arith.constant 0 : index
    %c0_14 = arith.constant 0 : index
    %15 = vector.load %arg7[%c0_13, %c0_14] : memref<1x128xf32, #tpu.memory_space<vmem>>, vector<1x128xf32>
    %16 = vector.broadcast %15 : vector<1x128xf32> to vector<8x128xf32>
    %17 = arith.addf %14, %16 : vector<8x128xf32>
    %c0_15 = arith.constant 0 : index
    %c0_16 = arith.constant 0 : index
    %18 = vector.load %arg8[%c0_15, %c0_16] : memref<8x128xf32, #tpu.memory_space<vmem>>, vector<8x128xf32>
    tpu.vector_store %arg8[%c0_15, %c0_16], %17 {strides = array<i32>} : memref<8x128xf32, #tpu.memory_space<vmem>>, vector<8x128xf32>,
    return
  }
  func.func @transform_0(%arg0: i32) -> (i32, i32) {
    %c0_i32 = arith.constant 0 : i32
    %c0_i32_0 = arith.constant 0 : i32
    return %arg0, %c0_i32 : i32, i32
  }
  func.func @transform_1(%arg0: i32) -> (i32, i32) {
    %c0_i32 = arith.constant 0 : i32
    %c0_i32_0 = arith.constant 0 : i32
    %c0_i32_1 = arith.constant 0 : i32
    return %c0_i32, %c0_i32_0 : i32, i32
  }
  func.func @transform_2(%arg0: i32) -> (i32, i32) {
    %c0_i32 = arith.constant 0 : i32
    %c0_i32_0 = arith.constant 0 : i32
    %c0_i32_1 = arith.constant 0 : i32
    return %c0_i32, %c0_i32_0 : i32, i32
  }
  func.func @transform_3(%arg0: i32) -> (i32, i32) {
    %c0_i32 = arith.constant 0 : i32
    %c0_i32_0 = arith.constant 0 : i32
    %c0_i32_1 = arith.constant 0 : i32
    return %c0_i32, %c0_i32_0 : i32, i32
  }
  func.func @transform_4(%arg0: i32) -> (i32, i32) {
    %c0_i32 = arith.constant 0 : i32
    %c0_i32_0 = arith.constant 0 : i32
    %c0_i32_1 = arith.constant 0 : i32
    return %c0_i32, %c0_i32_0 : i32, i32
  }
  func.func @transform_5(%arg0: i32) -> (i32, i32) {
    %c0_i32 = arith.constant 0 : i32
    %c0_i32_0 = arith.constant 0 : i32
    %c0_i32_1 = arith.constant 0 : i32
    return %c0_i32, %c0_i32_0 : i32, i32
  }
  func.func @transform_6(%arg0: i32) -> (i32, i32) {
    %c0_i32 = arith.constant 0 : i32
    %c0_i32_0 = arith.constant 0 : i32
    %c0_i32_1 = arith.constant 0 : i32
    return %c0_i32, %c0_i32_0 : i32, i32
  }
  func.func @transform_7(%arg0: i32) -> (i32, i32) {
    %c0_i32 = arith.constant 0 : i32
    %c0_i32_0 = arith.constant 0 : i32
    return %arg0, %c0_i32 : i32, i32
  }
}

</mosaic_0001>

<bundles_post_ra>
// kernel: tpu_custom_call.1
= control target key start
LH: loop header
LB: loop body
LE: loop exit
PB: predicated region body
PF: predicated region fallthrough
CT: control target
= control target key end

     0   :  { %12 = vsyncpa [#allocation3], 0  ;;  %s796_s0 = inlined_call_operand.hbm [shape: f32[8,128], index: 0, kind: input, shape index: {}]   ;;  %s797_s1 = inlined_call_operand.hbm [shape: f32[128,128], index: 1, kind: input, shape index: {}]   ;;  %s798_s2 = inlined_call_operand.vmem [shape: f32[1,128], index: 2, kind: input, shape index: {}]   ;;  %s799_s3 = inlined_call_operand.hbm [shape: f32[128,128], index: 3, kind: input, shape index: {}]   ;;  %s800_s4 = inlined_call_operand.vmem [shape: f32[1,128], index: 4, kind: input, shape index: {}]   ;;  %s801_s5 = inlined_call_operand.hbm [shape: f32[128,128], index: 5, kind: input, shape index: {}]   ;;  %s802_s6 = inlined_call_operand.vmem [shape: f32[1,128], index: 6, kind: input, shape index: {}]   ;;  %s803_s7 = inlined_call_operand.hbm [shape: f32[8,128], index: 7, kind: output, shape index: {}]  }
   0x1   :  { %13 = vsyncpa [#allocation6], 0 }
   0x2   :  { %14 = vsyncpa [#allocation9], 0 }
   0x3   :  { %15 = vsyncpa [#allocation4], 0  ;;  %s660_s24 = smov [#allocation5]  }
   0x4   :  { %s31_s25 = sshll.u32 %s660_s24, 4  ;;  %s32_s25 = int_to_ptr.vmem [resolvable:$true] %s31_s25 }
   0x5   :  { %s560_s26 = scalar_lea.vmem %s32_s25, 2048  ;;  %p565_p1 = scmp.lt.s32.totalorder %s32_s25, %s32_s25 }
   0x6   :  { %p561_p0 = scmp.ne.s32.totalorder %s32_s25, %s560_s26  ;;  %p566_p2 = scmp.lt.s32.totalorder %s560_s26, %s560_s26 }
   0x8   :  { %p567_p3 = por %p566_p2, %p565_p1 }
   0xa   :  { %p568_p4 = pnand %p567_p3, %p561_p0 }
   0xc   :  { %571 = shalt.err (!%p568_p4)
}
   0xd   :  { %s661_s27 = smov 128   ;;  %s662_s28 = smov 8  }
   0xe   :  { %37 = dma.hbm_to_vmem [thread:$0]  %s797_s1, 2048, %s32_s25, [#allocation6], %s661_s27, %s661_s27, %s662_s28  }
   0xf   :  { %s663_s8 = smov [#allocation2]   ;;  %s664_s10 = smov [#allocation7]  }
  0x10   :  { %s22_s9 = sshll.u32 %s663_s8, 4  ;;  %s45_s11 = sshll.u32 %s664_s10, 4  ;;  %s23_s9 = int_to_ptr.vmem [resolvable:$true] %s22_s9  ;;  %s46_s11 = int_to_ptr.vmem [resolvable:$true] %s45_s11 }
  0x11   :  { %s580_s12 = scalar_lea.vmem %s23_s9, 128  ;;  %p585_p6 = scmp.lt.s32.totalorder %s23_s9, %s23_s9 }
  0x12   :  { %p581_p5 = scmp.ne.s32.totalorder %s23_s9, %s580_s12  ;;  %p586_p7 = scmp.lt.s32.totalorder %s580_s12, %s580_s12 }
  0x14   :  { %p587_p8 = por %p586_p7, %p585_p6 }
  0x16   :  { %p588_p9 = pnand %p587_p8, %p581_p5 }
  0x18   :  { %591 = shalt.err (!%p588_p9)
}
  0x19   :  { %25 = dma.hbm_to_vmem [thread:$0]  %s796_s0, 128, %s23_s9, [#allocation3]  }
  0x1a   :  { %s600_s15 = scalar_lea.vmem %s46_s11, 2048  ;;  %p605_p11 = scmp.lt.s32.totalorder %s46_s11, %s46_s11 }
  0x1b   :  { %p601_p10 = scmp.ne.s32.totalorder %s46_s11, %s600_s15  ;;  %p606_p12 = scmp.lt.s32.totalorder %s600_s15, %s600_s15 }
  0x1d   :  { %p607_p13 = por %p606_p12, %p605_p11 }
  0x1f   :  { %p608_p0 = pnand %p607_p13, %p601_p10 }
  0x21   :  { %611 = shalt.err (!%p608_p0)
}
  0x22   :  { %51 = dma.hbm_to_vmem [thread:$0]  %s799_s3, 2048, %s46_s11, [#allocation6], %s661_s27, %s661_s27, %s662_s28  }
  0x23   :  { %s665_s17 = smov [#allocation8]  }
  0x24   :  { %s59_s18 = sshll.u32 %s665_s17, 4  ;;  %s60_s18 = int_to_ptr.vmem [resolvable:$true] %s59_s18 }
  0x25   :  { %s620_s19 = scalar_lea.vmem %s60_s18, 2048  ;;  %p625_p2 = scmp.lt.s32.totalorder %s60_s18, %s60_s18 }
  0x26   :  { %p621_p1 = scmp.ne.s32.totalorder %s60_s18, %s620_s19  ;;  %p626_p3 = scmp.lt.s32.totalorder %s620_s19, %s620_s19 }
  0x28   :  { %p627_p4 = por %p626_p3, %p625_p2 }
  0x2a   :  { %p628_p5 = pnand %p627_p4, %p621_p1 }
  0x2c   :  { %631 = shalt.err (!%p628_p5)
}
  0x2d   :  { %65 = dma.hbm_to_vmem [thread:$0]  %s801_s5, 2048, %s60_s18, [#allocation9], %s661_s27, %s661_s27, %s662_s28  }
  0x2e   :  { %652 = dma.done.wait [#allocation3], 128  }
  0x2f   :  { %653 = vsyncadd [#allocation3], 4294967168 }
  0x30   :  { %654 = dma.done.wait [#allocation6], 4096  }
  0x31   :  { %655 = vsyncadd [#allocation6], 4294963200 }
  0x32   :  { %656 = dma.done.wait [#allocation9], 2048  }
  0x33   :  { %657 = vsyncadd [#allocation9], 4294965248  ;;  %v666_v0 = vmov 0.0   ;;  %vm667_vm0 = vmmov 0   ;;  %v96_v1 = vld [vmem:[#allocation5 + $0x78] sm:$0xff]  ;;  %v95_v2 = vld [vmem:[#allocation5 + $0x70] sm:$0xff] }
  0x34   :  { %434 = vmatprep.subr.mxu0 %v666_v0  ;;  %466 = vmatprep.mubr.msk.f32.mxu0 %vm667_vm0, %v666_v0  ;;  %v94_v3 = vld [vmem:[#allocation5 + $0x68] sm:$0xff]  ;;  %v93_v4 = vld [vmem:[#allocation5 + $0x60] sm:$0xff]  ;;  %v190_v5 = vld [vmem:[#allocation7 + $0x78] sm:$0xff]  ;;  %s668_s24 = smov [#allocation10]  }
  0x35   :  { %469 = vmatprep.subr.mxu1 %v666_v0  ;;  %501 = vmatprep.mubr.msk.f32.mxu1 %vm667_vm0, %v666_v0  ;;  %v92_v6 = vld [vmem:[#allocation5 + $0x58] sm:$0xff]  ;;  %v189_v7 = vld [vmem:[#allocation7 + $0x70] sm:$0xff]  ;;  %v188_v8 = vld [vmem:[#allocation7 + $0x68] sm:$0xff]  ;;  %s369_s25 = sshll.u32 %s668_s24, 4  ;;  %s370_s25 = int_to_ptr.vmem [resolvable:$true] %s369_s25 }
  0x36   :  { %435 = vmatpush3.msra.mxu0 %v96_v1  ;;  %470 = vmatpush3.msra.mxu1 %v190_v5  ;;  %v91_v9 = vld [vmem:[#allocation5 + $0x50] sm:$0xff]  ;;  %v187_v10 = vld [vmem:[#allocation7 + $0x60] sm:$0xff]  ;;  %v90_v11 = vld [vmem:[#allocation5 + $0x48] sm:$0xff]  ;;  %s632_s26 = scalar_lea.vmem %s370_s25, 128  ;;  %p637_p7 = scmp.lt.s32.totalorder %s370_s25, %s370_s25 }
  0x37   :  { %436 = vmatprep.subr.mxu0 %v666_v0  ;;  %471 = vmatprep.subr.mxu1 %v666_v0  ;;  %v186_v12 = vld [vmem:[#allocation7 + $0x58] sm:$0xff]  ;;  %v89_v13 = vld [vmem:[#allocation5 + $0x40] sm:$0xff]  ;;  %v185_v14 = vld [vmem:[#allocation7 + $0x50] sm:$0xff]  ;;  %p633_p6 = scmp.ne.s32.totalorder %s370_s25, %s632_s26  ;;  %p638_p8 = scmp.lt.s32.totalorder %s632_s26, %s632_s26 }
  0x38   :  { %437 = vmatpush3.msra.mxu0 %v95_v2  ;;  %472 = vmatpush3.msra.mxu1 %v189_v7  ;;  %v88_v15 = vld [vmem:[#allocation5 + $0x38] sm:$0xff]  ;;  %v184_v16 = vld [vmem:[#allocation7 + $0x48] sm:$0xff]  ;;  %v87_v17 = vld [vmem:[#allocation5 + $0x30] sm:$0xff] }
  0x39   :  { %438 = vmatprep.subr.mxu0 %v666_v0  ;;  %473 = vmatprep.subr.mxu1 %v666_v0  ;;  %v86_v18 = vld [vmem:[#allocation5 + $0x28] sm:$0xff]  ;;  %v85_v19 = vld [vmem:[#allocation5 + $0x20] sm:$0xff]  ;;  %v84_v20 = vld [vmem:[#allocation5 + $0x18] sm:$0xff]  ;;  %p639_p9 = por %p638_p8, %p637_p7 }
  0x3a   :  { %439 = vmatpush3.msra.mxu0 %v94_v3  ;;  %474 = vmatpush3.msra.mxu1 %v188_v8  ;;  %v83_v21 = vld [vmem:[#allocation5 + $0x10] sm:$0xff]  ;;  %v82_v22 = vld [vmem:[#allocation5 + $0x8] sm:$0xff]  ;;  %v81_v23 = vld [vmem:[#allocation5] sm:$0xff] }
  0x3b   :  { %440 = vmatprep.subr.mxu0 %v666_v0  ;;  %475 = vmatprep.subr.mxu1 %v666_v0  ;;  %v80_v24 = vld [vmem:[#allocation2] sm:$0xff]  ;;  %v183_v25 = vld [vmem:[#allocation7 + $0x40] sm:$0xff]  ;;  %v181_v27 = vld [vmem:[#allocation7 + $0x30] sm:$0xff]  ;;  %p640_p10 = pnand %p639_p9, %p633_p6 }
  0x3c   :  { %441 = vmatpush3.msra.mxu0 %v93_v4  ;;  %476 = vmatpush3.msra.mxu1 %v187_v10  ;;  %v182_v26 = vld [vmem:[#allocation7 + $0x38] sm:$0xff]  ;;  %v180_v28 = vld [vmem:[#allocation7 + $0x28] sm:$0xff]  ;;  %v179_v29 = vld [vmem:[#allocation7 + $0x20] sm:$0xff] }
  0x3d   :  { %442 = vmatprep.subr.mxu0 %v666_v0  ;;  %477 = vmatprep.subr.mxu1 %v666_v0  ;;  %v178_v30 = vld [vmem:[#allocation7 + $0x18] sm:$0xff]  ;;  %v177_v31 = vld [vmem:[#allocation7 + $0x10] sm:$0xff]  ;;  %v176_v32 = vld [vmem:[#allocation7 + $0x8] sm:$0xff] }
  0x3e   :  { %443 = vmatpush3.msra.mxu0 %v92_v6  ;;  %478 = vmatpush3.msra.mxu1 %v186_v12  ;;  %v175_v33 = vld [vmem:[#allocation7] sm:$0xff]  ;;  %v284_v34 = vld [vmem:[#allocation8 + $0x78] sm:$0xff]  ;;  %v283_v35 = vld [vmem:[#allocation8 + $0x70] sm:$0xff] }
  0x3f   :  { %444 = vmatprep.subr.mxu0 %v666_v0  ;;  %479 = vmatprep.subr.mxu1 %v666_v0  ;;  %v282_v36 = vld [vmem:[#allocation8 + $0x68] sm:$0xff]  ;;  %v281_v37 = vld [vmem:[#allocation8 + $0x60] sm:$0xff]  ;;  %v280_v38 = vld [vmem:[#allocation8 + $0x58] sm:$0xff] }
  0x40   :  { %445 = vmatpush3.msra.mxu0 %v91_v9  ;;  %480 = vmatpush3.msra.mxu1 %v185_v14  ;;  %v279_v39 = vld [vmem:[#allocation8 + $0x50] sm:$0xff]  ;;  %v278_v40 = vld [vmem:[#allocation8 + $0x48] sm:$0xff]  ;;  %v380_v41 = vld [vmem:[%s798_s2] ss:$0 sm:$0xff] }
  0x41   :  { %446 = vmatprep.subr.mxu0 %v666_v0  ;;  %481 = vmatprep.subr.mxu1 %v666_v0  ;;  %v277_v46 = vld [vmem:[#allocation8 + $0x40] sm:$0xff]  ;;  %v276_v47 = vld [vmem:[#allocation8 + $0x38] sm:$0xff]  ;;  %v275_v48 = vld [vmem:[#allocation8 + $0x30] sm:$0xff] }
  0x42   :  { %447 = vmatpush3.msra.mxu0 %v90_v11  ;;  %482 = vmatpush3.msra.mxu1 %v184_v16  ;;  %v274_v49 = vld [vmem:[#allocation8 + $0x28] sm:$0xff]  ;;  %v273_v50 = vld [vmem:[#allocation8 + $0x20] sm:$0xff]  ;;  %v272_v51 = vld [vmem:[#allocation8 + $0x18] sm:$0xff] }
  0x43   :  { %448 = vmatprep.subr.mxu0 %v666_v0  ;;  %483 = vmatprep.subr.mxu1 %v666_v0  ;;  %v271_v52 = vld [vmem:[#allocation8 + $0x10] sm:$0xff]  ;;  %v270_v53 = vld [vmem:[#allocation8 + $0x8] sm:$0xff]  ;;  %v269_v54 = vld [vmem:[#allocation8] sm:$0xff] }
  0x44   :  { %449 = vmatpush3.msra.mxu0 %v89_v13  ;;  %484 = vmatpush3.msra.mxu1 %v183_v25  ;;  %v381_v55 = vld [vmem:[%s800_s4] ss:$0 sm:$0xff] }
  0x45   :  { %450 = vmatprep.subr.mxu0 %v666_v0  ;;  %485 = vmatprep.subr.mxu1 %v666_v0  ;;  %v382_v60 = vld [vmem:[%s802_s6] ss:$0 sm:$0xff] }
  0x46   :  { %451 = vmatpush3.msra.mxu0 %v88_v15  ;;  %486 = vmatpush3.msra.mxu1 %v182_v26 }
  0x47   :  { %452 = vmatprep.subr.mxu0 %v666_v0  ;;  %487 = vmatprep.subr.mxu1 %v666_v0 }
  0x48   :  { %453 = vmatpush3.msra.mxu0 %v87_v17  ;;  %488 = vmatpush3.msra.mxu1 %v181_v27 }
  0x49   :  { %454 = vmatprep.subr.mxu0 %v666_v0  ;;  %489 = vmatprep.subr.mxu1 %v666_v0 }
  0x4a   :  { %455 = vmatpush3.msra.mxu0 %v86_v18  ;;  %490 = vmatpush3.msra.mxu1 %v180_v28 }
  0x4b   :  { %456 = vmatprep.subr.mxu0 %v666_v0  ;;  %491 = vmatprep.subr.mxu1 %v666_v0 }
  0x4c   :  { %457 = vmatpush3.msra.mxu0 %v85_v19  ;;  %492 = vmatpush3.msra.mxu1 %v179_v29 }
  0x4d   :  { %458 = vmatprep.subr.mxu0 %v666_v0  ;;  %493 = vmatprep.subr.mxu1 %v666_v0 }
  0x4e   :  { %459 = vmatpush3.msra.mxu0 %v84_v20  ;;  %494 = vmatpush3.msra.mxu1 %v178_v30 }
  0x4f   :  { %460 = vmatprep.subr.mxu0 %v666_v0  ;;  %495 = vmatprep.subr.mxu1 %v666_v0 }
  0x50   :  { %461 = vmatpush3.msra.mxu0 %v83_v21  ;;  %496 = vmatpush3.msra.mxu1 %v177_v31 }
  0x51   :  { %462 = vmatprep.subr.mxu0 %v666_v0  ;;  %497 = vmatprep.subr.mxu1 %v666_v0 }
  0x52   :  { %463 = vmatpush3.msra.mxu0 %v82_v22  ;;  %498 = vmatpush3.msra.mxu1 %v176_v32 }
  0x53   :  { %464 = vmatprep.subr.mxu0 %v666_v0  ;;  %499 = vmatprep.subr.mxu1 %v666_v0 }
  0x54   :  { %465 = vmatpush3.msra.mxu0 %v81_v23  ;;  %500 = vmatpush3.msra.mxu1 %v175_v33 }
  0x55   :  { %467 = vmatmul.mubr.f32.vlgmr.msra.gmra.mxu0 %v80_v24  ;;  %504 = vmatprep.subr.mxu0 %v666_v0 }
  0x56   :  { %536 = vmatprep.mubr.msk.f32.mxu0 %vm667_vm0, %v666_v0  ;;  %505 = vmatpush3.msra.mxu0 %v284_v34 }
  0x57   :  { %506 = vmatprep.subr.mxu0 %v666_v0 }
  0x58   :  { %507 = vmatpush3.msra.mxu0 %v283_v35 }
  0x59   :  { %508 = vmatprep.subr.mxu0 %v666_v0 }
  0x5a   :  { %509 = vmatpush3.msra.mxu0 %v282_v36 }
  0x5b   :  { %510 = vmatprep.subr.mxu0 %v666_v0 }
  0x5c   :  { %511 = vmatpush3.msra.mxu0 %v281_v37 }
  0x5d   :  { %512 = vmatprep.subr.mxu0 %v666_v0 }
  0x5e   :  { %513 = vmatpush3.msra.mxu0 %v280_v38 }
  0x5f   :  { %514 = vmatprep.subr.mxu0 %v666_v0 }
  0x60   :  { %515 = vmatpush3.msra.mxu0 %v279_v39 }
  0x61   :  { %516 = vmatprep.subr.mxu0 %v666_v0 }
  0x62   :  { %517 = vmatpush3.msra.mxu0 %v278_v40 }
  0x63   :  { %518 = vmatprep.subr.mxu0 %v666_v0 }
  0x64   :  { %519 = vmatpush3.msra.mxu0 %v277_v46 }
  0x65   :  { %520 = vmatprep.subr.mxu0 %v666_v0 }
  0x66   :  { %521 = vmatpush3.msra.mxu0 %v276_v47 }
  0x67   :  { %522 = vmatprep.subr.mxu0 %v666_v0 }
  0x68   :  { %523 = vmatpush3.msra.mxu0 %v275_v48 }
  0x69   :  { %524 = vmatprep.subr.mxu0 %v666_v0 }
  0x6a   :  { %525 = vmatpush3.msra.mxu0 %v274_v49 }
  0x6b   :  { %526 = vmatprep.subr.mxu0 %v666_v0 }
  0x6c   :  { %527 = vmatpush3.msra.mxu0 %v273_v50 }
  0x6d   :  { %528 = vmatprep.subr.mxu0 %v666_v0 }
  0x6e   :  { %529 = vmatpush3.msra.mxu0 %v272_v51 }
  0x6f   :  { %530 = vmatprep.subr.mxu0 %v666_v0 }
  0x70   :  { %531 = vmatpush3.msra.mxu0 %v271_v52 }
  0x71   :  { %532 = vmatprep.subr.mxu0 %v666_v0 }
  0x72   :  { %533 = vmatpush3.msra.mxu0 %v270_v53 }
  0x73   :  { %534 = vmatprep.subr.mxu0 %v666_v0 }
  0x74   :  { %535 = vmatpush3.msra.mxu0 %v269_v54 }
 0x115   :  { %v170_v42 = vpop.f32.mrf.mxu0 }
 0x116   :  { %v171_v43 = vadd.f32 %v380_v41, %v170_v42 }
 0x117   :  { %v468_v44 = vpop.f32.mrf.mxu0 }
 0x118   :  { %548 = vtanh.f32 %v171_v43 }
 0x125   :  { %v549_v45 = vpop.eup %548 }
 0x126   :  { %502 = vmatmul.mubr.f32.vlgmr.msra.gmra.mxu1 %v549_v45 }
 0x1e6   :  { %v264_v56 = vpop.f32.mrf.mxu1 }
 0x1e7   :  { %v265_v57 = vadd.f32 %v381_v55, %v264_v56 }
 0x1e8   :  { %v503_v58 = vpop.f32.mrf.mxu1 }
 0x1e9   :  { %550 = vtanh.f32 %v265_v57 }
 0x1f6   :  { %v551_v59 = vpop.eup %550 }
 0x1f7   :  { %537 = vmatmul.mubr.f32.vlgmr.msra.gmra.mxu0 %v551_v59 }
 0x2b7   :  { %v358_v61 = vpop.f32.mrf.mxu0 }
 0x2b8   :  { %v359_v62 = vadd.f32 %v382_v60, %v358_v61 }
 0x2b9   :  { %v538_v63 = vpop.f32.mrf.mxu0 }
 0x2ba   :  { %362 = vst [vmem:[#allocation10] sm:$0xff] %v359_v62 }
 0x2bb   :  { %643 = shalt.err (!%p640_p10)
}
 0x2bc   :  { %372 = dma.vmem_to_hbm [thread:$0]  %s370_s25, 128, %s803_s7, [#allocation4]  }
 0x2bd   :  { %658 = dma.done.wait [#allocation4], 128  }
 0x2be   :  { %659 = vsyncadd [#allocation4], 4294967168 }
 0x2bf   :  { %376 = vsyncpa [#allocation3], 1 }
 0x2c0   :  { %377 = vsyncpa [#allocation6], 1 }
 0x2c1   :  { %378 = vsyncpa [#allocation9], 1 }
 0x2c2   :  { %379 = vsyncpa [#allocation4], 1 }

</bundles_post_ra>
